<compile_context>
chip_gen: v7x
topology: tpu7x:2x2x1
jax: 0.10.0
libtpu: 0.0.40
codegen_flags: <defaults>
</compile_context>

<pallas_src>
import jax
import jax.numpy as jnp
from jax.experimental import pallas as pl
from jax.experimental.pallas import tpu as pltpu


def _round_up(a, b):
    return ((a + b - 1) // b) * b


def _make_cls_score_kernel(apply_sigmoid: bool):
    def kernel(x_ref, w_ref, b_ref, o_ref):
        # x_ref: (TILE_N, D) VMEM   w_ref: (1, D) VMEM   b_ref: (1,) SMEM
        # o_ref: (TILE_N, 1)
        x = x_ref[...].astype(jnp.float32)
        w = w_ref[...].astype(jnp.float32)            # (1, D) broadcasts over rows
        # Lane-dense VPU multiply + cross-lane reduce (f32 accumulation).
        logits = jnp.sum(x * w, axis=-1, keepdims=True)  # (TILE_N, 1)
        logits = logits + b_ref[0]                       # scalar bias from SMEM
        if apply_sigmoid:
            logits = jax.nn.sigmoid(logits)
        o_ref[...] = logits.astype(o_ref.dtype)

    return kernel


def fast_rcnn_outputs_no_regression_fwd(
    x, weight, bias, *, training=False, tile_n=None
):
    """weight: (1, dim_in) as in nn.Linear; bias: (1,). Returns (N, 1)."""
    if x.ndim == 4:
        # torch: x.squeeze(3).squeeze(2) -- only valid for H == W == 1.
        assert x.shape[2] == 1 and x.shape[3] == 1, (
            "4D input must have H == W == 1 (roi-pooled features), got "
            f"{x.shape}"
        )
        x = x.reshape(x.shape[0], x.shape[1])
    N, D = x.shape

    # Row tile: multiple of 8 sublanes, capped so a double-buffered f32 tile
    # stays well inside the default scoped VMEM on every generation
    # (512 rows * 2048 feats * 4 B = 4 MiB per buffer).
    if tile_n is None:
        tile_n = min(512, _round_up(N, 8))
    tile_n = _round_up(tile_n, 8)

    n_pad = _round_up(N, tile_n)
    if n_pad != N:
        x = jnp.pad(x, ((0, n_pad - N), (0, 0)))

    w = weight.reshape(1, D)                      # lane-dense (features on lanes)
    b = bias.reshape(1).astype(jnp.float32)       # scalar in SMEM

    kernel = _make_cls_score_kernel(apply_sigmoid=not training)
    grid = (n_pad // tile_n,)

    out = pl.pallas_call(
        kernel,
        out_shape=jax.ShapeDtypeStruct((n_pad, 1), x.dtype),
        grid=grid,
        in_specs=[
            pl.BlockSpec((tile_n, D), lambda i: (i, 0)),               # x tile
            pl.BlockSpec((1, D), lambda i: (0, 0)),                    # weight (resident)
            pl.BlockSpec(memory_space=pltpu.SMEM),                     # bias scalar
        ],
        out_specs=pl.BlockSpec((tile_n, 1), lambda i: (i, 0)),
        compiler_params=pltpu.CompilerParams(
            dimension_semantics=("parallel",),
        ),
    )(x, w, b)

    return out[:N]


def init_params(key, dim_in, dtype=jnp.float32):
    # init.normal_(weight, std=0.01); init.constant_(bias, 0)
    wkey, _ = jax.random.split(key)
    weight = 0.01 * jax.random.normal(wkey, (1, dim_in), dtype=dtype)
    bias = jnp.zeros((1,), dtype=dtype)
    return weight, bias


def _reference(x, weight, bias, training):
    if x.ndim == 4:
        x = x.reshape(x.shape[0], x.shape[1])
    out = x @ weight.T + bias
    if not training:
        out = jax.nn.sigmoid(out)
    return out


if __name__ == "__main__":
    key = jax.random.PRNGKey(0)
    k_x, k_p, k_x2 = jax.random.split(key, 3)

    # --- Case 1: 4D roi-pooled-style input (N, C, 1, 1), eval mode (sigmoid) ---
    batch, dim_in = 4, 32
    x = jax.random.normal(k_x, (batch, dim_in, 1, 1), dtype=jnp.float32)
    weight, bias = init_params(k_p, dim_in)
    # bias nonzero to actually exercise the add
    bias = bias + 0.1

    cls_score = fast_rcnn_outputs_no_regression_fwd(x, weight, bias, training=False)
    cls_score = jax.block_until_ready(cls_score)
    ref = _reference(x, weight, bias, training=False)
    assert cls_score.shape == (batch, 1)
    assert jnp.allclose(cls_score, ref, atol=1e-5, rtol=1e-5)

    # --- Case 2: 2D input, N not a multiple of the tile, multi-block grid,
    #             training mode (no sigmoid) ---
    batch2, dim_in2 = 20, 64
    x2 = jax.random.normal(k_x2, (batch2, dim_in2), dtype=jnp.float32)
    weight2, bias2 = init_params(k_p, dim_in2)
    bias2 = bias2 - 0.05

    out2 = fast_rcnn_outputs_no_regression_fwd(
        x2, weight2, bias2, training=True, tile_n=8
    )
    out2 = jax.block_until_ready(out2)
    ref2 = _reference(x2, weight2, bias2, training=True)
    assert out2.shape == (batch2, 1)
    assert jnp.allclose(out2, ref2, atol=1e-5, rtol=1e-5)

    print("KERNEL_OK")
</pallas_src>

<mosaic_0001>
module attributes {stable_mosaic.version = 11 : i64} {
  func.func @kernel(%arg0: i32, %arg1: memref<8x32xf32, #tpu.memory_space<vmem>>, %arg2: memref<1x32xf32, #tpu.memory_space<vmem>>, %arg3: memref<1xf32, #tpu.memory_space<smem>>, %arg4: memref<8x1xf32, #tpu.memory_space<vmem>>) attributes {dimension_semantics = [#tpu.dimension_semantics<parallel>], iteration_bounds = array<i64: 1>, scalar_prefetch = 0 : i64, scratch_operands = 0 : i64, tpu.core_type = #tpu.core_type<tc>, window_params = [{transform_indices = @transform_0, window_bounds = array<i64: 8, 32>}, {pipeline_mode = #tpu.pipeline_mode<synchronous>, transform_indices = @transform_1, window_bounds = array<i64: 1, 32>}, {transform_indices = @transform_2, window_bounds = array<i64: 1>}, {transform_indices = @transform_3, window_bounds = array<i64: 8, 1>}]} {
    %c0 = arith.constant 0 : index
    %c0_0 = arith.constant 0 : index
    %0 = vector.load %arg1[%c0, %c0_0] : memref<8x32xf32, #tpu.memory_space<vmem>>, vector<8x32xf32>
    %c0_1 = arith.constant 0 : index
    %c0_2 = arith.constant 0 : index
    %1 = vector.load %arg2[%c0_1, %c0_2] : memref<1x32xf32, #tpu.memory_space<vmem>>, vector<1x32xf32>
    %2 = vector.broadcast %1 : vector<1x32xf32> to vector<8x32xf32>
    %3 = arith.mulf %0, %2 : vector<8x32xf32>
    %cst = arith.constant dense<0.000000e+00> : vector<8xf32>
    %4 = vector.multi_reduction <add>, %3, %cst [1] : vector<8x32xf32> to vector<8xf32>
    %5 = vector.shape_cast %4 : vector<8xf32> to vector<8x1xf32>
    %c0_3 = arith.constant 0 : index
    %6 = memref.load %arg3[%c0_3] : memref<1xf32, #tpu.memory_space<smem>>
    %7 = vector.broadcast %6 : f32 to vector<8x1xf32>
    %8 = arith.addf %5, %7 : vector<8x1xf32>
    %9 = arith.negf %8 : vector<8x1xf32>
    %10 = math.exp %9 : vector<8x1xf32>
    %cst_4 = arith.constant 1.000000e+00 : f32
    %11 = vector.broadcast %cst_4 : f32 to vector<8x1xf32>
    %12 = arith.addf %11, %10 : vector<8x1xf32>
    %13 = arith.divf %11, %12 : vector<8x1xf32>
    %c0_5 = arith.constant 0 : index
    %c0_6 = arith.constant 0 : index
    %14 = vector.load %arg4[%c0_5, %c0_6] : memref<8x1xf32, #tpu.memory_space<vmem>>, vector<8x1xf32>
    tpu.vector_store %arg4[%c0_5, %c0_6], %13 {strides = array<i32>} : memref<8x1xf32, #tpu.memory_space<vmem>>, vector<8x1xf32>,
    return
  }
  func.func @transform_0(%arg0: i32) -> (i32, i32) {
    %c0_i32 = arith.constant 0 : i32
    %c0_i32_0 = arith.constant 0 : i32
    return %arg0, %c0_i32 : i32, i32
  }
  func.func @transform_1(%arg0: i32) -> (i32, i32) {
    %c0_i32 = arith.constant 0 : i32
    %c0_i32_0 = arith.constant 0 : i32
    %c0_i32_1 = arith.constant 0 : i32
    return %c0_i32, %c0_i32_0 : i32, i32
  }
  func.func @transform_2(%arg0: i32) -> i32 {
    %c0_i32 = arith.constant 0 : i32
    %c0_i32_0 = arith.constant 0 : i32
    return %c0_i32 : i32
  }
  func.func @transform_3(%arg0: i32) -> (i32, i32) {
    %c0_i32 = arith.constant 0 : i32
    %c0_i32_0 = arith.constant 0 : i32
    return %arg0, %c0_i32 : i32, i32
  }
}

</mosaic_0001>

<bundles_post_ra>
// kernel: tpu_custom_call.1
= control target key start
LH: loop header
LB: loop body
LE: loop exit
PB: predicated region body
PF: predicated region fallthrough
CT: control target
= control target key end

     0   :  { %9 = vsyncpa [#allocation4], 0  ;;  %s87_s12 = smov [#allocation3]   ;;  %s129_s0 = inlined_call_operand.hbm [shape: f32[8,32], index: 0, kind: input, shape index: {}]   ;;  %s130_s1 = inlined_call_operand.vmem [shape: f32[1,32], index: 1, kind: input, shape index: {}]   ;;  %s131_s2 = inlined_call_operand.<no memory space> [shape: f32[1], index: 2, kind: input, shape index: {}]   ;;  %s132_s3 = inlined_call_operand.vmem [shape: f32[8,1], index: 3, kind: output, shape index: {}]  }
   0x1   :  { %s16_s13 = sshll.u32 %s87_s12, 4  ;;  %s63_s16 = scalar_lea.hbm %s129_s0, 128  ;;  %s17_s13 = int_to_ptr.vmem [resolvable:$true] %s16_s13 }
   0x2   :  { %p64_p0 = scmp.ne.s32.totalorder %s129_s0, %s63_s16  ;;  %p67_p1 = scmp.lt.u32.totalorder %s63_s16, %s129_s0 }
   0x4   :  { %p69_p2 = pnand %p67_p1, %p64_p0 }
   0x6   :  { %72 = shalt.err (!%p69_p2)
}
   0x7   :  { %s73_s21 = scalar_lea.vmem %s17_s13, 128  ;;  %p78_p4 = scmp.lt.s32.totalorder %s17_s13, %s17_s13 }
   0x8   :  { %p74_p3 = scmp.ne.s32.totalorder %s17_s13, %s73_s21  ;;  %p79_p5 = scmp.lt.s32.totalorder %s73_s21, %s73_s21 }
   0xa   :  { %p80_p6 = por %p79_p5, %p78_p4 }
   0xc   :  { %p81_p7 = pnand %p80_p6, %p74_p3 }
   0xe   :  { %84 = shalt.err (!%p81_p7)
}
   0xf   :  { %19 = dma.hbm_to_vmem [thread:$0]  %s129_s0, 128, %s17_s13, [#allocation4]  }
  0x10   :  { %85 = dma.done.wait [#allocation4], 128  }
  0x11   :  { %86 = vsyncadd [#allocation4], 4294967168  ;;  %v27_v0 = vld [vmem:[#allocation3] sm:$0xff]  ;;  %vm36_vm0 = vcmask 261120   ;;  %v41_v4 = vstv %s131_s2  ;;  %vm49_vm1 = vcmask 7168  }
  0x12   :  { %v56_v1 = vld [vmem:[%s130_s1] ss:$0 sm:$0xff] }
  0x13   :  { %v35_v2 = vmul.f32 %v56_v1, %v27_v0 }
  0x15   :  { %v37_v3 = vsel %vm36_vm0, %v35_v2, 0.0 }
  0x16   :  { %38 = vadd.xlane.f32.xlu0 %v37_v3 }
  0xa3   :  { %v39_v5 = vpop.xlane.xlu0 %38 }
  0xa4   :  { %v42_v6 = vadd.f32 %v41_v4, %v39_v5 }
  0xa6   :  { %v57_v7 = vmul.f32 -1.442695, %v42_v6 }
  0xa8   :  { %59 = vpow2.f32 %v57_v7 }
  0xb2   :  { %v60_v8 = vpop.eup %59 }
  0xb3   :  { %v46_v9 = vadd.f32 1.0, %v60_v8 }
  0xb5   :  { %61 = vrcp.f32 %v46_v9 }
  0xbf   :  { %v62_v10 = vpop.eup %61 }
  0xc0   :  { %50 = vst.msk [vmem:[%s132_s3] sm:$0xff] %vm49_vm1, %v62_v10 }
  0xc1   :  { %55 = vsyncpa [#allocation4], 1 }

</bundles_post_ra>
